<compile_context>
chip_gen: v6e
topology: v6e:2x2x1
jax: 0.10.0
libtpu: 0.0.40
codegen_flags: <defaults>
</compile_context>

<pallas_src>
import functools

import jax
import jax.numpy as jnp
from jax.experimental import pallas as pl
from jax.experimental.pallas import tpu as pltpu

GAMMA = 2.0    # module default; specialized as an explicit square in-kernel
SMOOTH = 1e-4


def _focal_loss_kernel(*refs, rem, has_alpha, needs_mask):
    if has_alpha:
        logit_ref, target_ref, alpha_ref, out_ref, acc_ref = refs
    else:
        logit_ref, target_ref, out_ref, acc_ref = refs
        alpha_ref = None

    j = pl.program_id(1)
    last_j = pl.num_programs(1) - 1

    # Per-batch accumulator: reset at the start of every n's j-sweep.
    @pl.when(j == 0)
    def _():
        acc_ref[...] = jnp.zeros_like(acc_ref)
        out_ref[...] = jnp.zeros_like(out_ref)

    logits = logit_ref[...].astype(jnp.float32)            # (C, TM)
    tgt = target_ref[...]                                   # (1, TM) int32
    C, TM = logits.shape

    # Softmax pieces over the class (sublane) axis; full softmax never materialized.
    m = jnp.max(logits, axis=0, keepdims=True)               # (1, TM)
    e = jnp.exp(logits - m)                                   # (C, TM)
    denom = jnp.sum(e, axis=0, keepdims=True)                  # (1, TM)

    # Boolean gather of the target class (no f32 one-hot temp, no extra multiply).
    cls = jax.lax.broadcasted_iota(jnp.int32, (C, TM), 0)
    onehot = cls == tgt                                        # (C, TM) bool
    e_t = jnp.sum(jnp.where(onehot, e, 0.0), axis=0, keepdims=True)   # (1, TM)

    pt = e_t * pl.reciprocal(denom, approx=False) + SMOOTH     # (1, TM)
    logpt = jnp.log(pt)

    w = 1.0 - pt                  # may be slightly negative when pt > 1
    focal = w * w                 # gamma == 2: explicit square (no pow / NaN)

    if has_alpha:
        alpha = alpha_ref[...].astype(jnp.float32)             # (C, 1)
        alpha_c = jnp.sum(jnp.where(onehot, alpha, 0.0),
                          axis=0, keepdims=True)               # (1, TM)
        loss = -alpha_c * focal * logpt
    else:
        loss = -focal * logpt

    # Lane-dense elementwise accumulation; mask only on the final (partial) tile.
    if needs_mask:
        @pl.when(j != last_j)
        def _():
            acc_ref[...] += loss

        @pl.when(j == last_j)
        def _():
            lane = jax.lax.broadcasted_iota(jnp.int32, loss.shape, 1)
            # Keep the select (NOT a multiply-by-mask): padded lanes may hold NaN/Inf.
            acc_ref[...] += jnp.where(lane < rem, loss, 0.0)
    else:
        acc_ref[...] += loss

    # Collapse this batch's accumulator to a scalar only once, on the last tile.
    @pl.when(j == last_j)
    def _():
        out_ref[...] = jnp.sum(acc_ref[...], keepdims=True)


def _vmem_capacity_bytes():
    try:
        info = pltpu.get_tpu_info()
        cap = getattr(info, "vmem_capacity_bytes", None)
        if cap:
            return int(cap)
    except Exception:
        pass
    return 64 * 1024 * 1024      # conservative (v7x per-TC physical VMEM)


def focal_loss_ori(logit_nchw, target_nhw, alpha=None, *, gamma=GAMMA,
                   tile_m=32768):
    """logit_nchw: (N, C, H, W) float; target_nhw: (N, H, W) int.
    Returns the scalar mean focal loss (reduction='mean', ignore_index=None)."""
    assert gamma == 2.0, "kernel specialized for the module default gamma=2"
    N, C, H, W = logit_nchw.shape
    HW = H * W
    M = N * HW

    # Native-layout views (no transpose, no HBM copy).
    logit3d = logit_nchw.reshape(N, C, HW)
    target3d = target_nhw.reshape(N, 1, HW).astype(jnp.int32)

    # VMEM budget per lane of the spatial tile:
    #   2*(C+1)*4  double-buffered logits + target input blocks
    #   2*C*4      exp()/select temporaries
    #   4          lane-dense accumulator scratch
    bytes_per_lane = 2 * (C + 1) * 4 + 2 * C * 4 + 4
    vmem_cap = _vmem_capacity_bytes()
    budget = int(vmem_cap * 0.6)          # headroom for Mosaic internal scratch

    if HW < 128:
        tile = HW
    else:
        cap_vmem = max(128, (budget // bytes_per_lane) // 128 * 128)
        cap_hw = pl.cdiv(HW, 128) * 128
        tile = max(128, min(max(tile_m, 128) // 128 * 128, cap_vmem, cap_hw))
    grid = (N, pl.cdiv(HW, tile))
    needs_mask = (HW % tile) != 0
    rem = HW % tile

    has_alpha = alpha is not None
    args = [logit3d, target3d]
    in_specs = [
        pl.BlockSpec((None, C, tile), lambda n, j: (n, 0, j)),   # logits tile
        pl.BlockSpec((None, 1, tile), lambda n, j: (n, 0, j)),   # target tile
    ]
    if has_alpha:
        if isinstance(alpha, (int, float)):
            alpha_arr = jnp.full((C,), float(alpha), jnp.float32)
        else:
            alpha_arr = jnp.asarray(alpha, jnp.float32).reshape(-1)
        assert alpha_arr.shape[0] == C, "the length not equal to number of class"
        args.append(alpha_arr.reshape(C, 1))
        in_specs.append(pl.BlockSpec((C, 1), lambda n, j: (0, 0)))  # resident

    kernel = functools.partial(
        _focal_loss_kernel, rem=rem,
        has_alpha=has_alpha, needs_mask=needs_mask)

    vmem_limit = int(min(vmem_cap,
                         max(32 * 1024 * 1024,
                             bytes_per_lane * tile + (4 << 20))))

    partials = pl.pallas_call(
        kernel,
        out_shape=jax.ShapeDtypeStruct((N, 1, 1), jnp.float32),
        grid_spec=pltpu.PrefetchScalarGridSpec(
            num_scalar_prefetch=0,
            grid=grid,
            in_specs=in_specs,
            out_specs=pl.BlockSpec((None, 1, 1), lambda n, j: (n, 0, 0)),
            scratch_shapes=[pltpu.VMEM((1, tile), jnp.float32)],
        ),
        compiler_params=pltpu.CompilerParams(
            # Per-batch partials are independent -> N axis can split across
            # TensorCores (v7x); the spatial reduction axis stays sequential.
            dimension_semantics=("parallel", "arbitrary"),
            vmem_limit_bytes=vmem_limit),
    )(*args)

    # reduction == 'mean' over all N*H*W positions (ignore_index is None).
    return (jnp.sum(partials) / M).astype(jnp.float32)


def _reference_focal_loss(logit_nchw, target_nhw, alpha=None):
    N, C, H, W = logit_nchw.shape
    if alpha is None:
        alpha = jnp.ones((C,), jnp.float32)
    else:
        alpha = jnp.asarray(alpha, jnp.float32).reshape(-1)
    prob = jax.nn.softmax(logit_nchw.astype(jnp.float32), axis=1)
    prob = jnp.transpose(prob, (0, 2, 3, 1)).reshape(-1, C)
    tgt = target_nhw.reshape(-1).astype(jnp.int32)
    pt = jnp.take_along_axis(prob, tgt[:, None], axis=1)[:, 0] + SMOOTH
    logpt = jnp.log(pt)
    alpha_c = alpha[tgt]
    w = 1.0 - pt
    loss = -alpha_c * w * w * logpt
    return jnp.mean(loss)


if __name__ == "__main__":
    key = jax.random.PRNGKey(0)
    k1, k2 = jax.random.split(key)

    N, C, H, W = 2, 4, 16, 16
    logit = jax.random.normal(k1, (N, C, H, W), jnp.float32)
    target = jax.random.randint(k2, (N, H, W), 0, C, jnp.int32)

    # Default path (alpha=None -> ones).
    out = focal_loss_ori(logit, target)
    out = jax.block_until_ready(out)
    ref = _reference_focal_loss(logit, target)
    assert jnp.allclose(out, ref, rtol=1e-5, atol=1e-6), (out, ref)

    # Explicit per-class alpha path.
    alpha = [0.25, 0.5, 0.75, 1.0]
    out_a = jax.block_until_ready(focal_loss_ori(logit, target, alpha=alpha))
    ref_a = _reference_focal_loss(logit, target, alpha=alpha)
    assert jnp.allclose(out_a, ref_a, rtol=1e-5, atol=1e-6), (out_a, ref_a)

    print("KERNEL_OK")
</pallas_src>

<mosaic_0001>
module attributes {stable_mosaic.version = 11 : i64} {
  func.func @_focal_loss_kernel(%arg0: i32, %arg1: i32, %arg2: memref<1x4x256xf32, #tpu.memory_space<vmem>>, %arg3: memref<1x1x256xi32, #tpu.memory_space<vmem>>, %arg4: memref<1x1x1xf32, #tpu.memory_space<vmem>>, %arg5: memref<1x256xf32, #tpu.memory_space<vmem>>) attributes {dimension_semantics = [#tpu.dimension_semantics<parallel>, #tpu.dimension_semantics<arbitrary>], iteration_bounds = array<i64: 2, 1>, scalar_prefetch = 0 : i64, scratch_operands = 1 : i64, tpu.core_type = #tpu.core_type<tc>, window_params = [{transform_indices = @transform_0, window_bounds = array<i64: 1, 4, 256>}, {transform_indices = @transform_1, window_bounds = array<i64: 1, 1, 256>}, {transform_indices = @transform_2, window_bounds = array<i64: 1, 1, 1>}]} {
    %c0_i32 = arith.constant 0 : i32
    %0 = arith.cmpi eq, %arg1, %c0_i32 : i32
    %1 = arith.extui %0 : i1 to i32
    %c0_i32_0 = arith.constant 0 : i32
    %2 = arith.cmpi ne, %1, %c0_i32_0 : i32
    scf.if %2 {
      %cst_18 = arith.constant 0.000000e+00 : f32
      %38 = vector.broadcast %cst_18 : f32 to vector<1x256xf32>
      %c0_19 = arith.constant 0 : index
      %c0_20 = arith.constant 0 : index
      %39 = vector.load %arg5[%c0_19, %c0_20] : memref<1x256xf32, #tpu.memory_space<vmem>>, vector<1x256xf32>
      tpu.vector_store %arg5[%c0_19, %c0_20], %38 {strides = array<i32>} : memref<1x256xf32, #tpu.memory_space<vmem>>, vector<1x256xf32>,
      %cst_21 = arith.constant 0.000000e+00 : f32
      %40 = vector.broadcast %cst_21 : f32 to vector<1x1xf32>
      %c0_22 = arith.constant 0 : index
      %c0_23 = arith.constant 0 : index
      %c0_24 = arith.constant 0 : index
      %41 = vector.load %arg4[%c0_22, %c0_23, %c0_24] : memref<1x1x1xf32, #tpu.memory_space<vmem>>, vector<1x1x1xf32>
      %42 = vector.shape_cast %41 : vector<1x1x1xf32> to vector<1x1xf32>
      %43 = vector.shape_cast %40 : vector<1x1xf32> to vector<1x1x1xf32>
      tpu.vector_store %arg4[%c0_22, %c0_23, %c0_24], %43 {strides = array<i32>} : memref<1x1x1xf32, #tpu.memory_space<vmem>>, vector<1x1x1xf32>,
    } else {
    }
    %c0 = arith.constant 0 : index
    %c0_1 = arith.constant 0 : index
    %c0_2 = arith.constant 0 : index
    %3 = vector.load %arg2[%c0, %c0_1, %c0_2] : memref<1x4x256xf32, #tpu.memory_space<vmem>>, vector<1x4x256xf32>
    %4 = vector.shape_cast %3 : vector<1x4x256xf32> to vector<4x256xf32>
    %c0_3 = arith.constant 0 : index
    %c0_4 = arith.constant 0 : index
    %c0_5 = arith.constant 0 : index
    %5 = vector.load %arg3[%c0_3, %c0_4, %c0_5] : memref<1x1x256xi32, #tpu.memory_space<vmem>>, vector<1x1x256xi32>
    %6 = vector.shape_cast %5 : vector<1x1x256xi32> to vector<1x256xi32>
    %cst = arith.constant dense<0xFF800000> : vector<256xf32>
    %7 = vector.multi_reduction <maximumf>, %4, %cst [0] : vector<4x256xf32> to vector<256xf32>
    %8 = vector.shape_cast %7 : vector<256xf32> to vector<1x256xf32>
    %9 = vector.broadcast %8 : vector<1x256xf32> to vector<4x256xf32>
    %10 = arith.subf %4, %9 : vector<4x256xf32>
    %11 = math.exp %10 : vector<4x256xf32>
    %cst_6 = arith.constant dense<0.000000e+00> : vector<256xf32>
    %12 = vector.multi_reduction <add>, %11, %cst_6 [0] : vector<4x256xf32> to vector<256xf32>
    %13 = vector.shape_cast %12 : vector<256xf32> to vector<1x256xf32>
    %14 = tpu.iota {dimensions = array<i32: 0>} : vector<4x256xi32>
    %15 = vector.broadcast %6 : vector<1x256xi32> to vector<4x256xi32>
    %16 = arith.cmpi eq, %14, %15 : vector<4x256xi32>
    %cst_7 = arith.constant 0.000000e+00 : f32
    %17 = vector.broadcast %cst_7 : f32 to vector<4x256xf32>
    %18 = arith.select %16, %11, %17 : vector<4x256xi1>, vector<4x256xf32>
    %cst_8 = arith.constant dense<0.000000e+00> : vector<256xf32>
    %19 = vector.multi_reduction <add>, %18, %cst_8 [0] : vector<4x256xf32> to vector<256xf32>
    %20 = vector.shape_cast %19 : vector<256xf32> to vector<1x256xf32>
    %21 = tpu.reciprocal %13 : vector<1x256xf32> -> vector<1x256xf32>
    %22 = arith.mulf %20, %21 : vector<1x256xf32>
    %cst_9 = arith.constant 9.99999974E-5 : f32
    %23 = vector.broadcast %cst_9 : f32 to vector<1x256xf32>
    %24 = arith.addf %22, %23 : vector<1x256xf32>
    %25 = math.log %24 : vector<1x256xf32>
    %cst_10 = arith.constant 1.000000e+00 : f32
    %26 = vector.broadcast %cst_10 : f32 to vector<1x256xf32>
    %27 = arith.subf %26, %24 : vector<1x256xf32>
    %28 = arith.mulf %27, %27 : vector<1x256xf32>
    %cst_11 = arith.constant 0.000000e+00 : f32
    %29 = vector.broadcast %cst_11 : f32 to vector<1x256xf32>
    %30 = arith.subf %29, %28 : vector<1x256xf32>
    %31 = arith.mulf %30, %25 : vector<1x256xf32>
    %c0_12 = arith.constant 0 : index
    %c0_13 = arith.constant 0 : index
    %32 = vector.load %arg5[%c0_12, %c0_13] : memref<1x256xf32, #tpu.memory_space<vmem>>, vector<1x256xf32>
    %33 = arith.addf %32, %31 : vector<1x256xf32>
    %c0_14 = arith.constant 0 : index
    %c0_15 = arith.constant 0 : index
    %34 = vector.load %arg5[%c0_14, %c0_15] : memref<1x256xf32, #tpu.memory_space<vmem>>, vector<1x256xf32>
    tpu.vector_store %arg5[%c0_14, %c0_15], %33 {strides = array<i32>} : memref<1x256xf32, #tpu.memory_space<vmem>>, vector<1x256xf32>,
    %c0_i32_16 = arith.constant 0 : i32
    %35 = arith.cmpi eq, %arg1, %c0_i32_16 : i32
    %36 = arith.extui %35 : i1 to i32
    %c0_i32_17 = arith.constant 0 : i32
    %37 = arith.cmpi ne, %36, %c0_i32_17 : i32
    scf.if %37 {
      %c0_18 = arith.constant 0 : index
      %c0_19 = arith.constant 0 : index
      %38 = vector.load %arg5[%c0_18, %c0_19] : memref<1x256xf32, #tpu.memory_space<vmem>>, vector<1x256xf32>
      %39 = vector.shape_cast %38 : vector<1x256xf32> to vector<1x1x256xf32>
      %cst_20 = arith.constant dense<0.000000e+00> : vector<1xf32>
      %40 = vector.multi_reduction <add>, %39, %cst_20 [1, 2] : vector<1x1x256xf32> to vector<1xf32>
      %41 = vector.shape_cast %40 : vector<1xf32> to vector<1x1x1xf32>
      %42 = vector.extract %41[0, 0, 0] : f32 from vector<1x1x1xf32>
      %43 = vector.broadcast %42 : f32 to vector<1x1xf32>
      %c0_21 = arith.constant 0 : index
      %c0_22 = arith.constant 0 : index
      %c0_23 = arith.constant 0 : index
      %44 = vector.load %arg4[%c0_21, %c0_22, %c0_23] : memref<1x1x1xf32, #tpu.memory_space<vmem>>, vector<1x1x1xf32>
      %45 = vector.shape_cast %44 : vector<1x1x1xf32> to vector<1x1xf32>
      %46 = vector.shape_cast %43 : vector<1x1xf32> to vector<1x1x1xf32>
      tpu.vector_store %arg4[%c0_21, %c0_22, %c0_23], %46 {strides = array<i32>} : memref<1x1x1xf32, #tpu.memory_space<vmem>>, vector<1x1x1xf32>,
    } else {
    }
    return
  }
  func.func @transform_0(%arg0: i32, %arg1: i32) -> (i32, i32, i32) {
    %c0_i32 = arith.constant 0 : i32
    %c0_i32_0 = arith.constant 0 : i32
    return %arg0, %c0_i32, %arg1 : i32, i32, i32
  }
  func.func @transform_1(%arg0: i32, %arg1: i32) -> (i32, i32, i32) {
    %c0_i32 = arith.constant 0 : i32
    %c0_i32_0 = arith.constant 0 : i32
    return %arg0, %c0_i32, %arg1 : i32, i32, i32
  }
  func.func @transform_2(%arg0: i32, %arg1: i32) -> (i32, i32, i32) {
    %c0_i32 = arith.constant 0 : i32
    %c0_i32_0 = arith.constant 0 : i32
    %c0_i32_1 = arith.constant 0 : i32
    return %arg0, %c0_i32, %c0_i32_0 : i32, i32, i32
  }
}

</mosaic_0001>

<bundles_post_ra>
// kernel: tpu_custom_call.1
= control target key start
LH: loop header
LB: loop body
LE: loop exit
PB: predicated region body
PF: predicated region fallthrough
CT: control target
= control target key end

     0   :  { %7 = vsyncpa [#allocation4], 0  ;;  %s853_s0 = inlined_call_operand.hbm [shape: f32[2,4,256], index: 0, kind: input, shape index: {}]   ;;  %s854_s1 = inlined_call_operand.hbm [shape: s32[2,1,256], index: 1, kind: input, shape index: {}]   ;;  %s855_s2 = inlined_call_operand.vmem [shape: f32[2,1,1], index: 2, kind: output, shape index: {}]  }
   0x1   :  { %9 = vsyncpa [#allocation4 + $0x1], 0 }
   0x2   :  { %10 = vsyncpa [#allocation6], 0 }
   0x3   :  { %12 = vsyncpa [#allocation6 + $0x1], 0  ;;  %s694_s9 = smov 0   ;;  %s696_s10 = smov 0  }
   0x4   :  { %s698_s11 = smov 0   ;;  %s700_s12 = smov 0  }
   0x5   :  { %s702_s13 = smov 0   ;;  %s704_s14 = smov 0  }
   0x6 LB: > { %s471_s15 = sadd.s32 4294967295, %s673_s14   ;;  %s30_s16 = sadd.s32 1, %s669_s13  ;;  %s673_s14 = sphi %s704_s14, %s18_s14   ;;  %s669_s13 = sphi %s702_s13, %s866_s13   ;;  %s665_s12 = sphi %s700_s12, %s865_s12   ;;  %s661_s11 = sphi %s698_s11, %s864_s11   ;;  %s657_s10 = sphi %s696_s10, %s863_s10   ;;  %s653_s9 = sphi %s694_s9, %s862_s9  }
   0x7   : > { %p32_p0 = scmp.ge.s32.totalorder %s30_s16, 2  ;;  %s39_s17 = sadd.s32 1, %s661_s11 }
   0x8   : > { %p46_p1 = scmp.ne.s32.totalorder %s661_s11, %s657_s10  ;;  %p47_p2 = scmp.eq.s32.totalorder %s673_s14, 0 }
   0x9   : > { %s868_s16 = smov (%p32_p0, %s30_s16), 0  ;;  %p52_p4 = scmp.ne.s32.totalorder %s657_s10, %s653_s9 }
   0xa   : > { %p730_p3 = por %p47_p2, %p46_p1  ;;  %s34_s19 = ssub.s32 %s669_s13, %s868_s16 }
   0xb   : > { %p53_p5 = scmp.eq.s32.totalorder %s471_s15, 0  ;;  %p37_p6 = scmp.eq.s32.totalorder %s34_s19, 0 }
   0xc   : > { %p501_p8 = scmp.lt.s32.totalorder %s673_s14, 2  ;;  %s746_s22 = sand.u32 1, %s661_s11  }
   0xd   : > { %p737_p7 = por %p53_p5, %p52_p4  ;;  %s486_s23 = sshll.u32 %s669_s13, 7 }
   0xe   : > { %s743_s21 = scalar_select %p37_p6, %s661_s11, %s39_s17  }
   0xf   : > { %s475_s24 = sshll.u32 %s746_s22, 3  ;;  %s142_s27 = scalar_lea.hbm %s853_s0, %s486_s23 }
  0x10   : > { %s134_s28 = scalar_lea.vmem [#allocation3], %s475_s24  ;;  %p755_p9 = pnand %p501_p8, %p730_p3 }
  0x11   : > { %s144_s29 = sshll.u32 %s134_s28, 4  ;;  %p481_p10 = scmp.ge.s32.totalorder %s673_s14, 1  ;;  %s145_s29 = int_to_ptr.vmem [resolvable:$true] %s144_s29 }
  0x12   : > { %p170_p11 = scmp.lt.s32.totalorder %s673_s14, 3  ;;  %s131_s3 = scalar_lea.sflag [#allocation4], %s746_s22 }
  0x13   : > { %p565_p12 = pneg %p755_p9  ;;  %s576_s4 = scalar_lea.vmem %s145_s29, 128 }
  0x14   : > { %p577_p13 = scmp.ne.s32.totalorder %s145_s29, %s576_s4  ;;  %s675_s5 = smov [#allocation3]  }
  0x15   : > { %s581_s6 = sshll.u32 %s675_s5, 4  ;;  %s582_s6 = int_to_ptr.vmem [resolvable:$false] %s581_s6 }
  0x16   : > { %p579_p0 = pnand %p577_p13, %p565_p12  ;;  %s583_s7 = scalar_lea.vmem %s582_s6, 256 }
  0x17   : > { %p584_p2 = scmp.lt.s32.totalorder %s145_s29, %s582_s6  ;;  %p585_p3 = scmp.lt.s32.totalorder %s583_s7, %s576_s4 }
  0x18   : > { %p580_p1 = pneg %p579_p0 }
  0x19   : > { %p586_p4 = por %p585_p3, %p584_p2 }
  0x1b   : > { %p587_p5 = pnand %p586_p4, %p580_p1 }
  0x1d   : > { %590 = shalt.err (!%p587_p5)
}
  0x1e   : > { %497 = dma.hbm_to_vmem [thread:$0]  (!%p755_p9), %s142_s27, 128, %s145_s29, %s131_s3  }
  0x1f   : > { %p773_p6 = pnand %p481_p10, %p170_p11  ;;  %s478_s9 = sshll.u32 %s746_s22, 1 }
  0x20   : > { %s487_s15 = sshll.u32 %s669_s13, 5  ;;  %s155_s23 = scalar_lea.vmem [#allocation5], %s478_s9 }
  0x21   : > { %s163_s19 = scalar_lea.hbm %s854_s1, %s487_s15  ;;  %s165_s24 = sshll.u32 %s155_s23, 4  ;;  %s166_s24 = int_to_ptr.vmem [resolvable:$true] %s165_s24 }
  0x22   : > { %s152_s25 = scalar_lea.sflag [#allocation6], %s746_s22  ;;  %s604_s26 = scalar_lea.vmem %s166_s24, 32 }
  0x23   : > { %p605_p8 = scmp.ne.s32.totalorder %s166_s24, %s604_s26  ;;  %s676_s27 = smov [#allocation5]  }
  0x24   : > { %s609_s28 = sshll.u32 %s676_s27, 4  ;;  %s610_s28 = int_to_ptr.vmem [resolvable:$false] %s609_s28 }
  0x25   : > { %p607_p13 = pnand %p605_p8, %p565_p12  ;;  %s611_s29 = scalar_lea.vmem %s610_s28, 64 }
  0x26   : > { %p612_p10 = scmp.lt.s32.totalorder %s166_s24, %s610_s28  ;;  %p613_p11 = scmp.lt.s32.totalorder %s611_s29, %s604_s26 }
  0x27   : > { %p608_p0 = pneg %p607_p13 }
  0x28   : > { %p614_p1 = por %p613_p11, %p612_p10 }
  0x2a   : > { %p615_p2 = pnand %p614_p1, %p608_p0 }
  0x2c   : > { %618 = shalt.err (!%p615_p2)
}
  0x2d   : > { %500 = dma.hbm_to_vmem [thread:$0]  (!%p755_p9), %s163_s19, 32, %s166_s24, %s152_s25  }
  0x2e   : > { %174 = sbr.rel (%p773_p6) target bundleno = 365 (0x16d), region = 28  ;;  %s176_s22 = sand.u32 (!%p773_p6), 1, %s657_s10  }
  0x2f   : > { %s482_s3 = sshll.u32 (!%p773_p6), %s176_s22, 3  ;;  %s177_s4 = scalar_lea.sflag (!%p773_p6), [#allocation4], %s176_s22 }
  0x30   : > { %s180_s5 = scalar_lea.vmem (!%p773_p6), [#allocation3], %s482_s3 }
  0x33   : > { %644 = dma.done.wait (%p737_p7), %s177_s4, 128  }
  0x34   : > { %646 = vsyncadd (%p737_p7), %s177_s4, 4294967168  ;;  %s483_s6 = sshll.u32 %s176_s22, 1  ;;  %s186_s7 = scalar_lea.sflag [#allocation6], %s176_s22 }
  0x35   : > { %s189_s9 = scalar_lea.vmem [#allocation5], %s483_s6 }
  0x36   : > { %648 = dma.done.wait (%p737_p7), %s186_s7, 32  }
  0x37   : > { %650 = vsyncadd (%p737_p7), %s186_s7, 4294967264  ;;  %v222_v0 = vlaneseq  ;;  %v677_v2 = vmov 0.0   ;;  %vm234_vm1 = vcmask 1043456   ;;  %v229_v3 = vld [vmem:[%s180_s5] sm:$0xff]  ;;  %v230_v24 = vld [vmem:[%s189_s9] sm:$0x3] }
  0x38   : > { %v232_v4 = vcombine.high %v229_v3, %v229_v3  ;;  %v235_v5 = vsel %vm234_vm1, %v229_v3, -inf  ;;  %vm359_vm4 = vcmask 1040384   ;;  %p215_p7 = scmp.lt.s32.totalorder %s665_s12, 1  ;;  %vm227_vm5 = vcmask 0  }
  0x39   : > { %vm799_vm0 = vcmp.lt.s32.totalorder %v222_v0, 256  ;;  %v236_v6 = vrot.slane %v235_v5, 4  ;;  %v808_v22 = vshrl.u32 %v222_v0, 7 }
  0x3a   : > { %226 = vst.msk [vmem:[#allocation2] sm:$0x3] %vm799_vm0, %v677_v2  ;;  %v242_v7 = vsel %vm234_vm1, %v232_v4, -inf  ;;  %s870_s12 = smov (!%p215_p7, %s665_s12), 1 }
  0x3b   : > { %v237_v8 = vmax.f32 %v235_v5, %v236_v6  ;;  %v243_v9 = vrot.slane %v242_v7, 4  ;;  %v277_v23 = vsub.s32 0, %v808_v22  ;;  %v281_v25 = vsub.s32 1, %v808_v22  ;;  %s217_s8 = scalar_lea.vmem %s855_s2, %s870_s12 }
  0x3c   : > { %228 = vst.msk [vmem:[%s217_s8] sm:$0x1] %vm227_vm5, %v677_v2 }
  0x3d   : > { %v238_v10 = vrot.slane %v237_v8, 2  ;;  %v244_v11 = vmax.f32 %v242_v7, %v243_v9  ;;  %v278_v26 = vrot.slane %v230_v24, %v277_v23  ;;  %v282_v27 = vrot.slane %v230_v24, %v281_v25 }
  0x3f   : > { %v239_v12 = vmax.f32 %v237_v8, %v238_v10  ;;  %v245_v13 = vrot.slane %v244_v11, 2  ;;  %vm283_vm2 = vcmp.eq.s32.totalorder %v808_v22, %v278_v26  ;;  %vm284_vm3 = vcmp.eq.s32.totalorder %v808_v22, %v282_v27 }
  0x40   : > { %v678_v8 = vmov 1966171168  }
  0x41   : > { %v240_v14 = vrot.slane %v239_v12, 1  ;;  %v246_v15 = vmax.f32 %v244_v11, %v245_v13  ;;  %v324_v9 = vunpack.c.l.s4 %v678_v8  ;;  %v319_v24 = vld [vmem:[#allocation2] sm:$0x3] }
  0x43   : > { %v241_v16 = vmax.f32 %v239_v12, %v240_v14  ;;  %v247_v17 = vrot.slane %v246_v15, 1  ;;  %v325_v14 = vunpack.c.0.s8 %v324_v9 }
  0x45   : > { %v248_v18 = vmax.f32 %v246_v15, %v247_v17 }
  0x47   : > { %v251_v19 = vcombine.low %v241_v16, %v248_v18 }
  0x49   : > { %v253_v20 = vsub.f32 %v229_v3, %v251_v19  ;;  %v328_v19 = vsub.s32 %v325_v14, %v808_v22 }
  0x4b   : > { %v254_v21 = vmul.f32 1.442695, %v253_v20 }
  0x4d   : > { %553 = vpow2.f32 %v254_v21 }
  0x5a   : > { %v554_v28 = vpop.eup %553 }
  0x5b   : > { %v257_v29 = vcombine.high %v554_v28, %v554_v28  ;;  %v259_v30 = vsel %vm234_vm1, %v554_v28, 0.0  ;;  %v285_v31 = vsel %vm283_vm2, %v554_v28, 0.0 }
  0x5c   : > { %v260_v32 = vrot.slane %v259_v30, 4  ;;  %v287_v33 = vsel %vm234_vm1, %v285_v31, 0.0 }
  0x5d   : > { %v266_v34 = vsel %vm234_vm1, %v257_v29, 0.0  ;;  %v286_v35 = vsel %vm284_vm3, %v257_v29, 0.0  ;;  %v288_v38 = vrot.slane %v287_v33, 4 }
  0x5e   : > { %v261_v36 = vadd.f32 %v260_v32, %v259_v30  ;;  %v267_v37 = vrot.slane %v266_v34, 4  ;;  %v294_v39 = vsel %vm234_vm1, %v286_v35, 0.0 }
  0x5f   : > { %v295_v42 = vrot.slane %v294_v39, 4  ;;  %v289_v45 = vadd.f32 %v288_v38, %v287_v33 }
  0x60   : > { %v262_v40 = vrot.slane %v261_v36, 2  ;;  %v268_v41 = vadd.f32 %v267_v37, %v266_v34 }
  0x61   : > { %v296_v48 = vadd.f32 %v295_v42, %v294_v39  ;;  %v290_v51 = vrot.slane %v289_v45, 2 }
  0x62   : > { %v263_v43 = vadd.f32 %v262_v40, %v261_v36  ;;  %v269_v44 = vrot.slane %v268_v41, 2 }
  0x63   : > { %v297_v53 = vrot.slane %v296_v48, 2  ;;  %v291_v54 = vadd.f32 %v290_v51, %v289_v45 }
  0x64   : > { %v264_v46 = vrot.slane %v263_v43, 1  ;;  %v270_v47 = vadd.f32 %v269_v44, %v268_v41 }
  0x65   : > { %v298_v55 = vadd.f32 %v297_v53, %v296_v48  ;;  %v292_v56 = vrot.slane %v291_v54, 1 }
  0x66   : > { %v265_v49 = vadd.f32 %v264_v46, %v263_v43  ;;  %v271_v50 = vrot.slane %v270_v47, 1 }
  0x67   : > { %v299_v57 = vrot.slane %v298_v55, 1  ;;  %v293_v58 = vadd.f32 %v292_v56, %v291_v54 }
  0x68   : > { %v272_v52 = vadd.f32 %v271_v50, %v270_v47  ;;  %555 = vrcp.f32 %v265_v49 }
  0x69   : > { %v300_v59 = vadd.f32 %v299_v57, %v298_v55 }
  0x6a   : > { %557 = vrcp.f32 %v272_v52 }
  0x75   : > { %v556_v60 = vpop.eup %555 }
  0x76   : > { %v303_v61 = vmul.f32 %v556_v60, %v293_v58 }
  0x77   : > { %v558_v62 = vpop.eup %557 }
  0x78   : > { %v304_v63 = vmul.f32 %v558_v62, %v300_v59  ;;  %v305_v0 = vadd.f32 0.0001, %v303_v61 }
  0x7a   : > { %v306_v3 = vadd.f32 0.0001, %v304_v63  ;;  %559 = vlog2.f32 %v305_v0  ;;  %v311_v4 = vsub.f32 1.0, %v305_v0 }
  0x7c   : > { %561 = vlog2.f32 %v306_v3  ;;  %v312_v5 = vsub.f32 1.0, %v306_v3  ;;  %v313_v6 = vmul.f32 %v311_v4, %v311_v4 }
  0x7e   : > { %v314_v7 = vmul.f32 %v312_v5, %v312_v5  ;;  %v315_v10 = vsub.f32 0.0, %v313_v6 }
  0x80   : > { %v316_v13 = vsub.f32 0.0, %v314_v7 }
  0x87   : > { %v560_v11 = vpop.eup %559 }
  0x88   : > { %v308_v12 = vmul.f32 0.6931472, %v560_v11 }
  0x89   : > { %v562_v15 = vpop.eup %561 }
  0x8a   : > { %v310_v16 = vmul.f32 0.6931472, %v562_v15  ;;  %v317_v17 = vmul.f32 %v315_v10, %v308_v12 }
  0x8c   : > { %v318_v18 = vmul.f32 %v316_v13, %v310_v16 }
  0x8e   : > { %v322_v20 = vcombine.low %v317_v17, %v318_v18 }
  0x90   : > { %v329_v21 = vrot.slane %v322_v20, %v328_v19 }
  0x92   : > { %v336_v26 = vrot.slane %v329_v21, %v328_v19 }
  0x94   : > { %v338_v27 = vadd.f32 %v336_v26, %v319_v24 }
  0x96   : > { %343 = vst.msk [vmem:[#allocation2] sm:$0x3] %vm799_vm0, %v338_v27 }
  0x9d   : > { %v347_v28 = vld [vmem:[#allocation2] sm:$0x3] }
  0x9e   : > { %v352_v29 = vrot.slane %v347_v28, %v277_v23  ;;  %v356_v30 = vrot.slane %v347_v28, %v281_v25 }
  0xa0   : > { %v360_v31 = vsel %vm359_vm4, %v352_v29, 0.0  ;;  %v361_v32 = vsel %vm359_vm4, %v356_v30, 0.0 }
  0xa1   : > { %v362_v33 = vadd.f32 %v361_v32, %v360_v31 }
  0xa3   : > { %363 = vadd.xlane.f32.xlu0 %v362_v33 }
 0x12c   : > { %v364_v1 = vpop.xlane.xlu0 %363 }
 0x12d   : > { %v365_v34 = vrot.slane %v364_v1, 4 }
 0x12f   : > { %v366_v35 = vadd.f32 %v365_v34, %v364_v1 }
 0x131   : > { %v367_v23 = vrot.slane %v366_v35, 2 }
 0x133   : > { %v368_v36 = vadd.f32 %v367_v23, %v366_v35 }
 0x135   : > { %v369_v22 = vrot.slane %v368_v36, 1 }
 0x137   : > { %v370_v25 = vadd.f32 %v369_v22, %v368_v36 }
 0x139   : > { %488 = vpush %v370_v25 }
 0x16a   : > { %s489_s15 = spop %488 }
 0x16b   : > { %v372_v37 = vstv %s489_s15 }
 0x16c   : > { %374 = vst.msk [vmem:[%s217_s8] sm:$0x1] %vm227_vm5, %v372_v37 }
 0x16d PF: > { %s18_s14 = sadd.s32 1, %s673_s14   ;;  %s862_s9 = smov %s657_s10 }
 0x16e   : > { %p15_p9 = scmp.ge.s32.totalorder %s18_s14, 4   ;;  %s863_s10 = smov %s661_s11 }
 0x16f   : > { %s864_s11 = smov %s743_s21  ;;  %s865_s12 = smov %s669_s13 }
 0x170   : > { %s866_s13 = smov %s868_s16  ;;  %17 = sbr.rel (!%p15_p9) target bundleno = 6 (0x6), region = 89 }
 0x175   :  { %392 = vsyncpa [#allocation4], 1 }
 0x176   :  { %394 = vsyncpa [#allocation4 + $0x1], 1 }
 0x177   :  { %395 = vsyncpa [#allocation6], 1 }
 0x178   :  { %397 = vsyncpa [#allocation6 + $0x1], 1 }

</bundles_post_ra>
